<compile_context>
chip_gen: v5e
topology: v5e:2x2
jax: 0.10.0
libtpu: 0.0.40
codegen_flags: <defaults>
</compile_context>

<pallas_src>
import functools

import jax
import jax.numpy as jnp
from jax.experimental import pallas as pl
from jax.experimental.pallas import tpu as pltpu


# ----------------------------- Pallas kernel -------------------------------

def _conv3x3_bias_relu_kernel(x_ref, w_ref, b_ref, o_ref, *, H, W, C_out, kH):
    """Fused 3x3 conv (kH banded matmuls) + bias + ReLU for one batch image.

    x_ref: (1, H + kH - 1, Wp*C_in)  bf16  spatially padded, (W, C) packed on lanes
    w_ref: (kH, Wp*C_in, W*C_out)    bf16  banded (block-Toeplitz) conv weight
    b_ref: (1, W*C_out)              f32   bias tiled along W
    o_ref: (1, H, W*C_out)           f32   lane-dense output tile
    """
    # Load the (small) padded tile once; upcast so the row-shifted slices below
    # are plain unpacked sublane shifts (no odd-offset packed-bf16 slicing).
    x32 = x_ref[0].astype(jnp.float32)                       # (Hp, Wp*C_in)

    acc = jnp.zeros((H, W * C_out), jnp.float32)
    for kh in range(kH):                                     # static unroll: kH matmuls
        xs = x32[kh:kh + H, :].astype(jnp.bfloat16)          # (H, Wp*C_in) bf16 -> MXU
        acc = acc + jnp.dot(xs, w_ref[kh],
                            preferred_element_type=jnp.float32)
    acc = acc + b_ref[...]                                   # f32 epilogue
    o_ref[0] = jnp.maximum(acc, 0.0).astype(o_ref.dtype)


# ------------------------------ wrapper (JAX) -------------------------------

def conv3x3_bias_relu(x_nchw, weight, bias):
    """Conv2d(C_in->C_out, 3x3, stride 1, pad 1) + ReLU via the Pallas kernel.

    x_nchw: (N, C_in, H, W) f32 (PyTorch layout) -> returns (N, C_out, H, W) f32.
    weight: (C_out, C_in, kH, kW) f32 (PyTorch OIHW); bias: (C_out,) f32.
    """
    N, C_in, H, W = x_nchw.shape
    C_out, _, kH, kW = weight.shape
    pad = kH // 2
    Hp, Wp = H + 2 * pad, W + 2 * pad

    # One-time boundary layout change: NCHW -> NHWC, zero-pad spatially, pack
    # (W, C) onto the lane axis, cast to bf16 to halve HBM->VMEM traffic.
    x_nhwc = jnp.transpose(x_nchw, (0, 2, 3, 1))
    x_padded = jnp.pad(x_nhwc, ((0, 0), (pad, pad), (pad, pad), (0, 0)))
    x_packed = x_padded.reshape(N, Hp, Wp * C_in).astype(jnp.bfloat16)

    # Fold the kW taps into a banded (block-Toeplitz) weight so the kernel only
    # needs kH row-shifted matmuls (the fused-im2col trick):
    #   w_band[kh, u*C_in + ci, v*C_out + co] = weight[co, ci, kh, u - v]
    #   (zero outside 0 <= u - v < kW)
    wt = jnp.transpose(weight, (2, 3, 1, 0))                 # (kH, kW, C_in, C_out)
    shift = jnp.stack([jnp.eye(Wp, W, k=-kw, dtype=weight.dtype)
                       for kw in range(kW)], axis=0)         # (kW, Wp, W)
    w_band = jnp.einsum('wuv,hwio->huivo', shift, wt)        # (kH, Wp, C_in, W, C_out)
    w_band = w_band.reshape(kH, Wp * C_in, W * C_out).astype(jnp.bfloat16)

    # Bias tiled along W so it adds directly onto the (H, W*C_out) tile (kept f32).
    b_row = jnp.tile(bias.astype(jnp.float32), W).reshape(1, W * C_out)

    kernel = functools.partial(_conv3x3_bias_relu_kernel,
                               H=H, W=W, C_out=C_out, kH=kH)

    flops = 2 * N * kH * H * (Wp * C_in) * (W * C_out)
    bytes_accessed = (x_packed.size * x_packed.dtype.itemsize
                      + w_band.size * w_band.dtype.itemsize
                      + b_row.size * 4
                      + N * H * W * C_out * 4)

    out = pl.pallas_call(
        kernel,
        out_shape=jax.ShapeDtypeStruct((N, H, W * C_out), jnp.float32),
        grid_spec=pl.GridSpec(
            # TODO(synk): for production image sizes, also tile H (with a halo row)
            # so per-block VMEM stays within v7x's 64 MiB budget.
            grid=(N,),
            in_specs=[
                pl.BlockSpec((1, Hp, Wp * C_in), lambda n: (n, 0, 0)),
                pl.BlockSpec((kH, Wp * C_in, W * C_out), lambda n: (0, 0, 0)),
                pl.BlockSpec((1, W * C_out), lambda n: (0, 0)),
            ],
            out_specs=pl.BlockSpec((1, H, W * C_out), lambda n: (n, 0, 0)),
        ),
        compiler_params=pltpu.CompilerParams(
            dimension_semantics=("parallel",)),
        cost_estimate=pl.CostEstimate(
            flops=flops, transcendentals=0, bytes_accessed=bytes_accessed),
    )(x_packed, w_band, b_row)

    # Back to PyTorch NCHW once, at the module boundary.
    return out.reshape(N, H, W, C_out).transpose(0, 3, 1, 2)


def pass2nd_forward(tup2, weight, bias):
    """Pass2nd.forward: ((x, passed)) -> (module(x), passed)."""
    x, passed = tup2
    return (conv3x3_bias_relu(x, weight, bias), passed)


# ------------------------------- main ---------------------------------------

if __name__ == "__main__":
    key = jax.random.PRNGKey(0)
    kx, kp, kw_, kb = jax.random.split(key, 4)

    N, C_in, H, W = 2, 4, 16, 16
    C_out, k = 8, 3

    x = jax.random.normal(kx, (N, C_in, H, W), dtype=jnp.float32)
    passed = jax.random.normal(kp, (N, C_in, H, W), dtype=jnp.float32)

    # Deterministic synthetic parameters (PyTorch Conv2d weight layout).
    fan_in = C_in * k * k
    weight = jax.random.normal(kw_, (C_out, C_in, k, k), dtype=jnp.float32) / jnp.sqrt(fan_in)
    bias = jax.random.normal(kb, (C_out,), dtype=jnp.float32) * 0.1

    y, passed_out = pass2nd_forward((x, passed), weight, bias)
    jax.block_until_ready(y)
    jax.block_until_ready(passed_out)

    # Reference: plain-JAX conv + ReLU computed from the same bf16-quantized
    # operands the kernel consumes (kernel accumulates in f32, epilogue f32).
    xq = x.astype(jnp.bfloat16).astype(jnp.float32)
    wq = weight.astype(jnp.bfloat16).astype(jnp.float32)
    ref = jax.lax.conv_general_dilated(
        xq, wq, window_strides=(1, 1), padding=((1, 1), (1, 1)),
        dimension_numbers=("NCHW", "OIHW", "NCHW"))
    ref = jnp.maximum(ref + bias[None, :, None, None], 0.0)

    assert y.shape == (N, C_out, H, W), "bad output shape"
    assert jnp.allclose(y, ref, atol=1e-3, rtol=1e-3), "conv mismatch"
    assert jnp.array_equal(passed_out, passed), "pass-through mismatch"

    print("KERNEL_OK")
</pallas_src>

<mosaic_0001>
module attributes {stable_mosaic.version = 11 : i64} {
  func.func @_conv3x3_bias_relu_kernel(%arg0: i32, %arg1: memref<1x18x72xbf16, #tpu.memory_space<vmem>>, %arg2: memref<3x72x128xbf16, #tpu.memory_space<vmem>>, %arg3: memref<1x128xf32, #tpu.memory_space<vmem>>, %arg4: memref<1x16x128xf32, #tpu.memory_space<vmem>>) attributes {dimension_semantics = [#tpu.dimension_semantics<parallel>], iteration_bounds = array<i64: 2>, scalar_prefetch = 0 : i64, scratch_operands = 0 : i64, tpu.core_type = #tpu.core_type<tc>, window_params = [{transform_indices = @transform_0, window_bounds = array<i64: 1, 18, 72>}, {pipeline_mode = #tpu.pipeline_mode<synchronous>, transform_indices = @transform_1, window_bounds = array<i64: 3, 72, 128>}, {pipeline_mode = #tpu.pipeline_mode<synchronous>, transform_indices = @transform_2, window_bounds = array<i64: 1, 128>}, {transform_indices = @transform_3, window_bounds = array<i64: 1, 16, 128>}]} {
    %c0 = arith.constant 0 : index
    %c0_0 = arith.constant 0 : index
    %c0_1 = arith.constant 0 : index
    %0 = vector.load %arg1[%c0, %c0_0, %c0_1] : memref<1x18x72xbf16, #tpu.memory_space<vmem>>, vector<1x18x72xbf16>
    %1 = vector.shape_cast %0 : vector<1x18x72xbf16> to vector<18x72xbf16>
    %2 = arith.extf %1 : vector<18x72xbf16> to vector<18x72xf32>
    %cst = arith.constant 0.000000e+00 : f32
    %3 = vector.broadcast %cst : f32 to vector<16x128xf32>
    %4 = vector.extract_strided_slice %2 {offsets = [0, 0], sizes = [16, 72], strides = [1, 1]} : vector<18x72xf32> to vector<16x72xf32>
    %5 = arith.truncf %4 : vector<16x72xf32> to vector<16x72xbf16>
    %c0_2 = arith.constant 0 : index
    %c0_3 = arith.constant 0 : index
    %c0_4 = arith.constant 0 : index
    %6 = vector.load %arg2[%c0_2, %c0_3, %c0_4] : memref<3x72x128xbf16, #tpu.memory_space<vmem>>, vector<1x72x128xbf16>
    %7 = vector.shape_cast %6 : vector<1x72x128xbf16> to vector<72x128xbf16>
    %cst_5 = arith.constant dense<0.000000e+00> : vector<16x128xf32>
    %8 = tpu.matmul %5, %7, %cst_5 {dimension_numbers = #tpu.dot_dimension_numbers<[1], [0], [0], [1], [0, 0, 1, 1], [], []>} : vector<16x72xbf16>, vector<72x128xbf16>, vector<16x128xf32> -> vector<16x128xf32>
    %9 = arith.addf %3, %8 : vector<16x128xf32>
    %10 = vector.extract_strided_slice %2 {offsets = [1, 0], sizes = [16, 72], strides = [1, 1]} : vector<18x72xf32> to vector<16x72xf32>
    %11 = arith.truncf %10 : vector<16x72xf32> to vector<16x72xbf16>
    %c1 = arith.constant 1 : index
    %c0_6 = arith.constant 0 : index
    %c0_7 = arith.constant 0 : index
    %12 = vector.load %arg2[%c1, %c0_6, %c0_7] : memref<3x72x128xbf16, #tpu.memory_space<vmem>>, vector<1x72x128xbf16>
    %13 = vector.shape_cast %12 : vector<1x72x128xbf16> to vector<72x128xbf16>
    %cst_8 = arith.constant dense<0.000000e+00> : vector<16x128xf32>
    %14 = tpu.matmul %11, %13, %cst_8 {dimension_numbers = #tpu.dot_dimension_numbers<[1], [0], [0], [1], [0, 0, 1, 1], [], []>} : vector<16x72xbf16>, vector<72x128xbf16>, vector<16x128xf32> -> vector<16x128xf32>
    %15 = arith.addf %9, %14 : vector<16x128xf32>
    %16 = vector.extract_strided_slice %2 {offsets = [2, 0], sizes = [16, 72], strides = [1, 1]} : vector<18x72xf32> to vector<16x72xf32>
    %17 = arith.truncf %16 : vector<16x72xf32> to vector<16x72xbf16>
    %c2 = arith.constant 2 : index
    %c0_9 = arith.constant 0 : index
    %c0_10 = arith.constant 0 : index
    %18 = vector.load %arg2[%c2, %c0_9, %c0_10] : memref<3x72x128xbf16, #tpu.memory_space<vmem>>, vector<1x72x128xbf16>
    %19 = vector.shape_cast %18 : vector<1x72x128xbf16> to vector<72x128xbf16>
    %cst_11 = arith.constant dense<0.000000e+00> : vector<16x128xf32>
    %20 = tpu.matmul %17, %19, %cst_11 {dimension_numbers = #tpu.dot_dimension_numbers<[1], [0], [0], [1], [0, 0, 1, 1], [], []>} : vector<16x72xbf16>, vector<72x128xbf16>, vector<16x128xf32> -> vector<16x128xf32>
    %21 = arith.addf %15, %20 : vector<16x128xf32>
    %c0_12 = arith.constant 0 : index
    %c0_13 = arith.constant 0 : index
    %22 = vector.load %arg3[%c0_12, %c0_13] : memref<1x128xf32, #tpu.memory_space<vmem>>, vector<1x128xf32>
    %23 = vector.broadcast %22 : vector<1x128xf32> to vector<16x128xf32>
    %24 = arith.addf %21, %23 : vector<16x128xf32>
    %cst_14 = arith.constant 0.000000e+00 : f32
    %25 = vector.broadcast %cst_14 : f32 to vector<16x128xf32>
    %26 = arith.maximumf %24, %25 : vector<16x128xf32>
    %c0_15 = arith.constant 0 : index
    %c0_16 = arith.constant 0 : index
    %c0_17 = arith.constant 0 : index
    %27 = vector.load %arg4[%c0_15, %c0_16, %c0_17] : memref<1x16x128xf32, #tpu.memory_space<vmem>>, vector<1x16x128xf32>
    %28 = vector.shape_cast %27 : vector<1x16x128xf32> to vector<16x128xf32>
    %29 = vector.shape_cast %26 : vector<16x128xf32> to vector<1x16x128xf32>
    tpu.vector_store %arg4[%c0_15, %c0_16, %c0_17], %29 {strides = array<i32>} : memref<1x16x128xf32, #tpu.memory_space<vmem>>, vector<1x16x128xf32>,
    return
  }
  func.func @transform_0(%arg0: i32) -> (i32, i32, i32) {
    %c0_i32 = arith.constant 0 : i32
    %c0_i32_0 = arith.constant 0 : i32
    %c0_i32_1 = arith.constant 0 : i32
    return %arg0, %c0_i32, %c0_i32_0 : i32, i32, i32
  }
  func.func @transform_1(%arg0: i32) -> (i32, i32, i32) {
    %c0_i32 = arith.constant 0 : i32
    %c0_i32_0 = arith.constant 0 : i32
    %c0_i32_1 = arith.constant 0 : i32
    %c0_i32_2 = arith.constant 0 : i32
    return %c0_i32, %c0_i32_0, %c0_i32_1 : i32, i32, i32
  }
  func.func @transform_2(%arg0: i32) -> (i32, i32) {
    %c0_i32 = arith.constant 0 : i32
    %c0_i32_0 = arith.constant 0 : i32
    %c0_i32_1 = arith.constant 0 : i32
    return %c0_i32, %c0_i32_0 : i32, i32
  }
  func.func @transform_3(%arg0: i32) -> (i32, i32, i32) {
    %c0_i32 = arith.constant 0 : i32
    %c0_i32_0 = arith.constant 0 : i32
    %c0_i32_1 = arith.constant 0 : i32
    return %arg0, %c0_i32, %c0_i32_0 : i32, i32, i32
  }
}

</mosaic_0001>

<bundles_post_ra>
// kernel: tpu_custom_call.1
= control target key start
LH: loop header
LB: loop body
LE: loop exit
PB: predicated region body
PF: predicated region fallthrough
CT: control target
= control target key end

     0   :  { %8 = vsyncpa [#allocation3], 0  ;;  %s846_s0 = inlined_call_operand.vmem [shape: bf16[2,18,72], index: 0, kind: input, shape index: {}]   ;;  %s847_s1 = inlined_call_operand.hbm [shape: bf16[3,72,128], index: 1, kind: input, shape index: {}]   ;;  %s848_s2 = inlined_call_operand.vmem [shape: f32[1,128], index: 2, kind: input, shape index: {}]   ;;  %s849_s3 = inlined_call_operand.hbm [shape: f32[2,16,128], index: 3, kind: output, shape index: {}]  }
   0x1   :  { %9 = vsyncpa [#allocation4], 0 }
   0x2   :  { %11 = vsyncpa [#allocation4 + $0x1], 0  ;;  %s748_s12 = smov 0   ;;  %s750_s13 = smov 0  }
   0x3   :  { %s752_s14 = smov 0   ;;  %s754_s15 = smov 0  }
   0x4 LB: > { %s769_s16 = sadd.s32 4294967295, %s721_s15   ;;  %s487_s17 = sadd.s32 4294967294, %s721_s15   ;;  %s721_s15 = sphi %s754_s15, %s855_s15   ;;  %s717_s14 = sphi %s752_s14, %s854_s14   ;;  %s713_s13 = sphi %s750_s13, %s853_s13   ;;  %s709_s12 = sphi %s748_s12, %s852_s12  }
   0x5   : > { %s773_s18 = sadd.s32 1, %s721_s15   ;;  %s92_s19 = sadd.s32 1, %s717_s14 }
   0x6   : > { %s89_s20 = ssub.s32 %s721_s15, %s773_s18  ;;  %p102_p0 = scmp.ne.s32.totalorder %s717_s14, %s713_s13 }
   0x7   : > { %p90_p1 = scmp.eq.s32.totalorder %s89_s20, 0  ;;  %p103_p2 = scmp.eq.s32.totalorder %s769_s16, 1 }
   0x8   : > { %p108_p3 = scmp.ne.s32.totalorder %s713_s13, %s709_s12  ;;  %p109_p4 = scmp.eq.s32.totalorder %s487_s17, 1 }
   0x9   : > { %s784_s21 = scalar_select %p90_p1, %s717_s14, %s92_s19  }
   0xa   : > { %p786_p5 = por %p103_p2, %p102_p0  ;;  %p790_p6 = por %p109_p4, %p108_p3 }
   0xb   : > { %p488_p7 = scmp.ge.s32.totalorder %s721_s15, 1  ;;  %p116_p8 = scmp.lt.s32.totalorder %s721_s15, 3 }
   0xc   : > { %p584_p9 = scmp.eq.s32.totalorder %s769_s16, 0  ;;  %s127_s26 = sshll.u32 %s847_s1, 4  ;;  %s128_s26 = int_to_ptr.hbm [resolvable:$true] %s127_s26 }
   0xd   : > { %p117_p10 = pnand %p488_p7, %p116_p8  ;;  %s723_s27 = smov [#allocation2]  }
   0xe   : > { %s129_s28 = sshll.u32 %s723_s27, 4  ;;  %s724_s29 = smov 64   ;;  %s130_s28 = int_to_ptr.vmem [resolvable:$true] %s129_s28 }
   0xf   : > { %p576_p11 = pneg %p117_p10  ;;  %s725_s30 = smov 4  }
  0x10   : > { %156 = sbr.rel (%p117_p10) target bundleno = 198 (0xc6), region = 32 }
  0x11   : > { %p577_p12 = pnand %p584_p9, %p576_p11 }
  0x13   : > { %579 = dma.hbm_to_vmem [thread:$0]  (!%p577_p12), %s128_s26, 1728, %s130_s28, [#allocation3], %s724_s29, %s724_s29, %s725_s30  }
  0x15   : > { %700 = dma.done.wait (%p584_p9), [#allocation3], 1728  }
  0x16   : > { %702 = vsyncadd (%p584_p9), [#allocation3], 4294965568  ;;  %p181_p13 = scmp.lt.s32.totalorder %s769_s16, 1  ;;  %v213_v0 = vld [vmem:[#allocation2 + $0x44] sm:$0xf]  ;;  %vm258_vm0 = vcmask 1043456  }
  0x17   : > { %v202_v1 = vld [vmem:[#allocation2 + $0x20] sm:$0xf]  ;;  %v331_v2 = vld [vmem:[#allocation2 + $0x68] sm:$0xf]  ;;  %v244_v3 = vunpack.c.l.b16 %v213_v0  ;;  %v559_v14 = vld [vmem:[#allocation2 + $0x18] sm:$0xff]  ;;  %vm334_vm2 = vcmask 1046528  }
  0x18   : > { %s182_s4 = scalar_select %p181_p13, %s769_s16, 1  ;;  %v293_v4 = vunpack.c.l.b16 %v202_v1  ;;  %v355_v5 = vunpack.c.l.b16 %v331_v2  ;;  %v563_v12 = vld [vmem:[#allocation2 + $0x3c] sm:$0xff]  ;;  %v562_v18 = vld [vmem:[#allocation2 + $0x34] sm:$0xff]  ;;  %v561_v23 = vld [vmem:[#allocation2 + $0x2c] sm:$0xff]  ;;  %vm214_vm1 = vsmask.f32 7424 }
  0x19   : > { %v249_v6 = vpack.c.b16 %v244_v3, %v244_v3  ;;  %v567_v17 = vld [vmem:[#allocation2 + $0x60] sm:$0xff]  ;;  %v558_v19 = vld [vmem:[#allocation2 + $0x10] sm:$0xff]  ;;  %v566_v22 = vld [vmem:[#allocation2 + $0x58] sm:$0xff]  ;;  %vm254_vm3 = vcmask 588800   ;;  %s178_s9 = sand.u32 1, %s713_s13   ;;  %s568_s19 = sshll.u32 %s769_s16, 4 }
  0x1a   : > { %s569_s5 = smul.u32 12, %s182_s4  ;;  %v298_v7 = vpack.c.b16 %v293_v4, %v293_v4  ;;  %v360_v8 = vpack.c.b16 %v355_v5, %v355_v5  ;;  %v557_v24 = vld [vmem:[#allocation2 + $0x8] sm:$0xff]  ;;  %v565_v28 = vld [vmem:[#allocation2 + $0x50] sm:$0xff]  ;;  %v556_v30 = vld [vmem:[#allocation2] sm:$0xff]  ;;  %s493_s17 = sshll.u32 %s178_s9, 4 }
  0x1b   : > { %v260_v9 = vsel %vm258_vm0, %v249_v6, 0  ;;  %v560_v29 = vld [vmem:[#allocation2 + $0x24] sm:$0xff]  ;;  %v624_v41 = vld [vmem:[%s848_s2] ss:$0 sm:$0xff]  ;;  %s409_s25 = scalar_lea.hbm %s849_s3, %s568_s19  ;;  %s180_s26 = scalar_lea.vmem [#allocation5], %s493_s17 }
  0x1c   : > { %s185_s8 = scalar_lea.vmem %s846_s0, %s569_s5  ;;  %v306_v10 = vsel %vm258_vm0, %v298_v7, 0  ;;  %v369_v11 = vsel %vm258_vm0, %v360_v8, 0  ;;  %265 = vmatpush.bf16.msra.mxu0 %v260_v9  ;;  %v564_v33 = vld [vmem:[#allocation2 + $0x48] sm:$0xff]  ;;  %s410_s27 = sshll.u32 %s180_s26, 4  ;;  %s411_s27 = int_to_ptr.vmem [resolvable:$true] %s410_s27 }
  0x1d   : > { %v189_v13 = vld [vmem:[%s185_s8 + $0x8] sm:$0x1]  ;;  %311 = vmatpush.bf16.msra.mxu1 %v306_v10  ;;  %v555_v15 = vld [vmem:[%s185_s8] sm:$0xff]  ;;  %374 = vmatpush.bf16.msra.mxu2 %v369_v11  ;;  %s412_s28 = sshll.u32 %s409_s25, 4  ;;  %s398_s16 = scalar_lea.sflag [#allocation4], %s178_s9  ;;  %s413_s28 = int_to_ptr.hbm [resolvable:$true] %s412_s28 }
  0x1e   : > { %v192_v16 = vunpack.c.l.bf16 %v189_v13  ;;  %v218_v21 = vshll.u32 %v555_v15, 16  ;;  %v216_v25 = vshrl.u32 %v555_v15, 16  ;;  %v335_v34 = vrot.slane %v555_v15, 1  ;;  %s669_s29 = sshra.s32 %s413_s28, 4  ;;  %s675_s6 = scalar_lea.hbm %s849_s3, 32  ;;  %s670_s29 = int_to_ptr.hbm [resolvable:$true] %s669_s29 }
  0x1f   : > { %s671_s30 = scalar_lea.hbm %s670_s29, 16  ;;  %p676_p3 = scmp.lt.s32.totalorder %s670_s29, %s849_s3 }
  0x20   : > { %266 = vmatpush.bf16.msra.mxu0 %v563_v12  ;;  %v203_v20 = vpack.c.bf16 %v192_v16, %v192_v16  ;;  %v220_v26 = vrot.slane %v218_v21, 1  ;;  %p672_p0 = scmp.ne.s32.totalorder %s670_s29, %s671_s30  ;;  %p677_p4 = scmp.lt.s32.totalorder %s675_s6, %s671_s30 }
  0x21   : > { %312 = vmatpush.bf16.msra.mxu1 %v559_v14  ;;  %375 = vmatpush.bf16.msra.mxu2 %v567_v17 }
  0x22   : > { %v223_v27 = vshll.u32 %v203_v20, 16  ;;  %v221_v31 = vor.u32 %v220_v26, %v216_v25  ;;  %v336_v35 = vrot.slane %v203_v20, 1  ;;  %p673_p1 = pnand %p672_p0, %p786_p5  ;;  %p678_p7 = por %p677_p4, %p676_p3 }
  0x24   : > { %267 = vmatpush.bf16.msra.mxu0 %v562_v18  ;;  %v225_v32 = vrot.slane %v223_v27, 1  ;;  %v337_v37 = vsel %vm334_vm2, %v335_v34, %v336_v35  ;;  %p674_p2 = pneg %p673_p1 }
  0x25   : > { %313 = vmatpush.bf16.msra.mxu1 %v558_v19  ;;  %376 = vmatpush.bf16.msra.mxu2 %v566_v22 }
  0x26   : > { %v226_v36 = vsel %vm214_vm1, %v221_v31, %v225_v32  ;;  %p679_p8 = pnand %p678_p7, %p674_p2 }
  0x28   : > { %268 = vmatpush.bf16.msra.mxu0 %v561_v23 }
  0x29   : > { %314 = vmatpush.bf16.msra.mxu1 %v557_v24  ;;  %377 = vmatpush.bf16.msra.mxu2 %v565_v28 }
  0x2c   : > { %269 = vmatpush.bf16.msra.mxu0 %v560_v29 }
  0x2d   : > { %315 = vmatpush.bf16.msra.mxu1 %v556_v30  ;;  %378 = vmatpush.bf16.msra.mxu2 %v564_v33 }
  0x2f   : > { %515 = vmatmul.msk.bf16.vlgmr.msra.gmra.mxu0 %vm254_vm3, %v226_v36 }
  0x30   : > { %532 = vmatmul.msk.bf16.vlgmr.msra.gmra.mxu1 %vm254_vm3, %v555_v15  ;;  %549 = vmatmul.msk.bf16.vlgmr.msra.gmra.mxu2 %vm254_vm3, %v337_v37 }
  0xac   : > { %v271_v38 = vpop.f32.mrf.mxu0 }
  0xad   : > { %v317_v39 = vpop.f32.mrf.mxu1 }
  0xae   : > { %v318_v40 = vadd.f32 %v317_v39, %v271_v38 }
  0xb3   : > { %v380_v42 = vpop.f32.mrf.mxu2 }
  0xb4   : > { %v385_v43 = vadd.f32 %v380_v42, %v318_v40  ;;  %v273_v45 = vpop.f32.mrf.mxu0 }
  0xb5   : > { %v319_v46 = vpop.f32.mrf.mxu1 }
  0xb6   : > { %v391_v44 = vadd.f32 %v624_v41, %v385_v43  ;;  %v320_v48 = vadd.f32 %v319_v46, %v273_v45 }
  0xb8   : > { %v393_v47 = vmax.f32 %v391_v44, 0.0 }
  0xba   : > { %395 = vst [vmem:[%s180_s26] sm:$0xff] %v393_v47 }
  0xbb   : > { %v382_v49 = vpop.f32.mrf.mxu2 }
  0xbc   : > { %v386_v50 = vadd.f32 %v382_v49, %v320_v48 }
  0xbe   : > { %v392_v51 = vadd.f32 %v624_v41, %v386_v50 }
  0xc0   : > { %v394_v52 = vmax.f32 %v392_v51, 0.0 }
  0xc2   : > { %396 = vst [vmem:[%s180_s26 + $0x8] sm:$0xff] %v394_v52 }
  0xc3   : > { %682 = shalt.err (!%p679_p8)
}
  0xc4   : > { %s726_s9 = smov 128   ;;  %s727_s10 = smov 8  }
  0xc5   : > { %574 = dma.vmem_to_hbm [thread:$0]  (%p786_p5), %s411_s27, 256, %s413_s28, %s398_s16, %s726_s9, %s726_s9, %s727_s10  }
  0xc6 PF: > { %p586_p9 = scmp.ge.s32.totalorder %s721_s15, 2  ;;  %s427_s11 = sand.u32 1, %s709_s12  }
  0xc7   : > { %s428_s17 = scalar_lea.sflag [#allocation4], %s427_s11 }
  0xc8   : > { %p581_p10 = pnand %p586_p9, %p790_p6 }
  0xca   : > { %p582_p11 = pneg %p581_p10 }
  0xcc   : > { %704 = dma.done.wait (%p582_p11), %s428_s17, 256  }
  0xcd   : > { %706 = vsyncadd (%p582_p11), %s428_s17, 4294967040  ;;  %p14_p12 = scmp.ge.s32.totalorder %s773_s18, 4   ;;  %s852_s12 = smov %s713_s13 }
  0xce   : > { %s853_s13 = smov %s717_s14  ;;  %s854_s14 = smov %s784_s21 }
  0xcf   : > { %s855_s15 = smov %s773_s18  ;;  %16 = sbr.rel (!%p14_p12) target bundleno = 4 (0x4), region = 74 }
  0xd4   :  { %434 = vsyncpa [#allocation3], 1 }
  0xd5   :  { %436 = vsyncpa [#allocation3 + $0x1], 1 }
  0xd6   :  { %437 = vsyncpa [#allocation4], 1 }
  0xd7   :  { %439 = vsyncpa [#allocation4 + $0x1], 1 }

</bundles_post_ra>
